<compile_context>
chip_gen: v6e
topology: v6e:2x2x1
jax: 0.10.0
libtpu: 0.0.40
codegen_flags: <defaults>
</compile_context>

<pallas_src>
import jax
import jax.numpy as jnp
from jax.experimental import pallas as pl
from jax.experimental.pallas import tpu as pltpu


def attention_kernel(x_ref, w_ref, b_ref, o_ref, m_sc, l_sc, acc_sc):
    # x_ref: (TB, TS, D) VMEM   w_ref: (1, D) VMEM   b_ref: (1, 1) SMEM
    # o_ref: (TB, D)            m_sc/l_sc: (TB, 1, 1) f32   acc_sc: (TB, 1, D) f32
    si = pl.program_id(1)

    @pl.when(si == 0)
    def _init():
        m_sc[...] = jnp.full_like(m_sc, -jnp.inf)
        l_sc[...] = jnp.zeros_like(l_sc)
        acc_sc[...] = jnp.zeros_like(acc_sc)

    # One cast per bounded tile, reused for both contractions below.
    xf = x_ref[...].astype(jnp.float32)                     # (TB, TS, D)
    w = w_ref[...].astype(jnp.float32)                      # (1, D), lane-dense
    b = b_ref[0, 0]                                         # scalar bias from SMEM

    # scores = x @ w + b kept as (TB, TS, 1): S stays on sublanes end-to-end so
    # no sublane<->lane relayout pair is needed around the softmax / e-broadcast.
    # (A (TS, D) @ (D, 1) matvec would waste the MXU; the tile is bounded so the
    #  VPU multiply + XLU reduce is the short path here.)
    s = jnp.sum(xf * w, axis=-1, keepdims=True) + b         # (TB, TS, 1)

    # Flash-style online softmax over the sequence grid axis (torch dim=1).
    m_prev = m_sc[...]                                      # (TB, 1, 1)
    m_new = jnp.maximum(m_prev, jnp.max(s, axis=1, keepdims=True))
    alpha = jnp.exp(m_prev - m_new)                         # rescale of old partials
    e = jnp.exp(s - m_new)                                  # (TB, TS, 1)  -> EUP

    l_sc[...] = alpha * l_sc[...] + jnp.sum(e, axis=1, keepdims=True)
    # Unnormalized weighted-sum accumulation; e broadcasts over the D lanes for free.
    acc_sc[...] = alpha * acc_sc[...] + jnp.sum(e * xf, axis=1, keepdims=True)
    m_sc[...] = m_new

    @pl.when(si == pl.num_programs(1) - 1)
    def _finalize():
        # Single exact divide of the (TB, D) accumulator by the running denom.
        # (approx=True reciprocal would break strict parity with the reference.)
        inv = pl.reciprocal(l_sc[...], approx=False)        # (TB, 1, 1)
        o_ref[...] = (acc_sc[...] * inv)[:, 0, :].astype(o_ref.dtype)


def _default_block_s(S, cap=512):
    """Largest sequence tile <= cap that satisfies the (8, 128) sublane rule."""
    if S <= cap:
        return S
    for cand in range(cap, 0, -8):          # multiples of 8 only
        if S % cand == 0:
            return cand
    # TODO(synk): mask partial S tiles to -inf to support ragged sequence tiling.
    return S


def attention_forward(x, w, b, *, block_b=None, block_s=None):
    """x: (B, S, D), w: (D, 1), b: (1, 1) -> (B, D). Matches torch Attention.forward."""
    B, S, D = x.shape

    if block_b is None:
        # Whole batch per step by default.  On v7x pass block_b = B // 2 (a
        # multiple of 8) so the "parallel" batch axis spans both TensorCores.
        block_b = B
    assert B % block_b == 0, "block_b must divide B"
    assert block_b == B or block_b % 8 == 0, "sublane constraint on batch block"

    if block_s is None:
        block_s = _default_block_s(S)
    assert S % block_s == 0, "block_s must divide S"
    assert block_s == S or block_s % 8 == 0, "sublane constraint on sequence block"

    w_row = jnp.asarray(w, jnp.float32).reshape(1, D)    # lane-dense weight row (VMEM)
    b_sc = jnp.asarray(b, jnp.float32).reshape(1, 1)     # scalar bias -> SMEM

    grid = (B // block_b, S // block_s)

    itemsize = jnp.dtype(x.dtype).itemsize
    # VMEM budget: double-buffered x tile + f32 scratch (m, l, acc) + resident
    # output block + weight row.  Raise the scoped limit only when needed
    # (v6e headroom up to ~100 MiB); on v7x choose block_s so this stays
    # within ~24-28 MiB per core.
    x_tile_bytes = block_b * block_s * D * itemsize
    scratch_bytes = 4 * block_b * (2 + D) + block_b * D * itemsize + D * 4
    vmem_need = 2 * x_tile_bytes + scratch_bytes
    vmem_limit_bytes = None
    if vmem_need > (32 << 20):
        vmem_limit_bytes = min(vmem_need * 5 // 4, 100 << 20)

    cost = pl.CostEstimate(
        flops=4 * B * S * D,               # score dot + weighted sum (mul + add each)
        transcendentals=B * S,             # one exp per score
        bytes_accessed=B * S * D * itemsize + B * D * itemsize + D * 4 + 4,
    )

    # NOTE: if production D (= 2*hidden) were < 128, fold batch tiles into the
    # output's lane dim (lane-dense vst) instead of a (block_b, D<128) store.
    return pl.pallas_call(
        attention_kernel,
        out_shape=jax.ShapeDtypeStruct((B, D), x.dtype),
        grid_spec=pltpu.PrefetchScalarGridSpec(
            num_scalar_prefetch=0,
            grid=grid,
            in_specs=[
                pl.BlockSpec((block_b, block_s, D), lambda bi, si: (bi, si, 0)),
                pl.BlockSpec((1, D), lambda bi, si: (0, 0)),
                pl.BlockSpec(memory_space=pltpu.MemorySpace.SMEM),
            ],
            out_specs=pl.BlockSpec((block_b, D), lambda bi, si: (bi, 0)),
            scratch_shapes=[
                pltpu.VMEM((block_b, 1, 1), jnp.float32),   # running max   m
                pltpu.VMEM((block_b, 1, 1), jnp.float32),   # running denom l
                pltpu.VMEM((block_b, 1, D), jnp.float32),   # unnormalized weighted sum
            ],
        ),
        compiler_params=pltpu.CompilerParams(
            dimension_semantics=("parallel", "arbitrary"),
            vmem_limit_bytes=vmem_limit_bytes,
        ),
        cost_estimate=cost,
    )(x, w_row, b_sc)


def attention_reference(x, w, b):
    # Pure-JAX reference matching the torch semantics (exact f32, no MXU path).
    scores = jnp.sum(x * w[:, 0][None, None, :], axis=-1, keepdims=True) + b[0, 0]  # (B, S, 1)
    weights = jax.nn.softmax(scores, axis=1)                                         # softmax over seq
    return jnp.sum(weights * x, axis=1)                                              # (B, D)


if __name__ == "__main__":
    hidden_size = 16
    B, S, D = 2, 16, hidden_size * 2   # D = hidden_size * 2, matching nn.Linear(hidden*2, 1)

    key = jax.random.PRNGKey(0)
    kx, kw, kb = jax.random.split(key, 3)

    x = jax.random.normal(kx, (B, S, D), dtype=jnp.float32)
    # Deterministic Linear(hidden*2, 1) parameters (synthetic init, no checkpoint).
    bound = 1.0 / (D ** 0.5)
    w = jax.random.uniform(kw, (D, 1), minval=-bound, maxval=bound, dtype=jnp.float32)
    b = jax.random.uniform(kb, (1, 1), minval=-bound, maxval=bound, dtype=jnp.float32)

    ref = attention_reference(x, w, b)

    # Multi-step S path: two "arbitrary" sequence tiles exercising the online
    # softmax / unnormalized accumulation across grid steps.
    out_tiled = jax.block_until_ready(attention_forward(x, w, b, block_s=8))
    assert out_tiled.shape == (B, D)
    assert jnp.allclose(out_tiled, ref, atol=1e-5, rtol=1e-5), "tiled-S mismatch vs reference"

    # Default path (single S step at these toy sizes).
    out = jax.block_until_ready(attention_forward(x, w, b))
    assert out.shape == (B, D)
    assert jnp.allclose(out, ref, atol=1e-5, rtol=1e-5), "mismatch vs reference"

    print("KERNEL_OK")
</pallas_src>

<mosaic_0001>
module attributes {stable_mosaic.version = 11 : i64} {
  func.func @attention_kernel(%arg0: i32, %arg1: i32, %arg2: memref<2x8x32xf32, #tpu.memory_space<vmem>>, %arg3: memref<1x32xf32, #tpu.memory_space<vmem>>, %arg4: memref<1x1xf32, #tpu.memory_space<smem>>, %arg5: memref<2x32xf32, #tpu.memory_space<vmem>>, %arg6: memref<2x1x1xf32, #tpu.memory_space<vmem>>, %arg7: memref<2x1x1xf32, #tpu.memory_space<vmem>>, %arg8: memref<2x1x32xf32, #tpu.memory_space<vmem>>) attributes {dimension_semantics = [#tpu.dimension_semantics<parallel>, #tpu.dimension_semantics<arbitrary>], iteration_bounds = array<i64: 1, 2>, scalar_prefetch = 0 : i64, scratch_operands = 3 : i64, tpu.core_type = #tpu.core_type<tc>, window_params = [{transform_indices = @transform_0, window_bounds = array<i64: 2, 8, 32>}, {pipeline_mode = #tpu.pipeline_mode<synchronous>, transform_indices = @transform_1, window_bounds = array<i64: 1, 32>}, {transform_indices = @transform_2, window_bounds = array<i64: 1, 1>}, {transform_indices = @transform_3, window_bounds = array<i64: 2, 32>}]} {
    %c0_i32 = arith.constant 0 : i32
    %0 = arith.cmpi eq, %arg1, %c0_i32 : i32
    %1 = arith.extui %0 : i1 to i32
    %c0_i32_0 = arith.constant 0 : i32
    %2 = arith.cmpi ne, %1, %c0_i32_0 : i32
    scf.if %2 {
      %cst_29 = arith.constant 0xFF800000 : f32
      %41 = vector.broadcast %cst_29 : f32 to vector<2x1x1xf32>
      %c0_30 = arith.constant 0 : index
      %c0_31 = arith.constant 0 : index
      %c0_32 = arith.constant 0 : index
      %42 = vector.load %arg6[%c0_30, %c0_31, %c0_32] : memref<2x1x1xf32, #tpu.memory_space<vmem>>, vector<2x1x1xf32>
      tpu.vector_store %arg6[%c0_30, %c0_31, %c0_32], %41 {strides = array<i32>} : memref<2x1x1xf32, #tpu.memory_space<vmem>>, vector<2x1x1xf32>,
      %cst_33 = arith.constant 0.000000e+00 : f32
      %43 = vector.broadcast %cst_33 : f32 to vector<2x1x1xf32>
      %c0_34 = arith.constant 0 : index
      %c0_35 = arith.constant 0 : index
      %c0_36 = arith.constant 0 : index
      %44 = vector.load %arg7[%c0_34, %c0_35, %c0_36] : memref<2x1x1xf32, #tpu.memory_space<vmem>>, vector<2x1x1xf32>
      tpu.vector_store %arg7[%c0_34, %c0_35, %c0_36], %43 {strides = array<i32>} : memref<2x1x1xf32, #tpu.memory_space<vmem>>, vector<2x1x1xf32>,
      %cst_37 = arith.constant 0.000000e+00 : f32
      %45 = vector.broadcast %cst_37 : f32 to vector<2x1x32xf32>
      %c0_38 = arith.constant 0 : index
      %c0_39 = arith.constant 0 : index
      %c0_40 = arith.constant 0 : index
      %46 = vector.load %arg8[%c0_38, %c0_39, %c0_40] : memref<2x1x32xf32, #tpu.memory_space<vmem>>, vector<2x1x32xf32>
      tpu.vector_store %arg8[%c0_38, %c0_39, %c0_40], %45 {strides = array<i32>} : memref<2x1x32xf32, #tpu.memory_space<vmem>>, vector<2x1x32xf32>,
    } else {
    }
    %c0 = arith.constant 0 : index
    %c0_1 = arith.constant 0 : index
    %c0_2 = arith.constant 0 : index
    %3 = vector.load %arg2[%c0, %c0_1, %c0_2] : memref<2x8x32xf32, #tpu.memory_space<vmem>>, vector<2x8x32xf32>
    %c0_3 = arith.constant 0 : index
    %c0_4 = arith.constant 0 : index
    %4 = vector.load %arg3[%c0_3, %c0_4] : memref<1x32xf32, #tpu.memory_space<vmem>>, vector<1x32xf32>
    %c0_5 = arith.constant 0 : index
    %c0_6 = arith.constant 0 : index
    %5 = memref.load %arg4[%c0_5, %c0_6] : memref<1x1xf32, #tpu.memory_space<smem>>
    %6 = vector.shape_cast %4 : vector<1x32xf32> to vector<1x1x32xf32>
    %7 = vector.broadcast %6 : vector<1x1x32xf32> to vector<2x8x32xf32>
    %8 = arith.mulf %3, %7 : vector<2x8x32xf32>
    %cst = arith.constant dense<0.000000e+00> : vector<2x8xf32>
    %9 = vector.multi_reduction <add>, %8, %cst [2] : vector<2x8x32xf32> to vector<2x8xf32>
    %10 = vector.shape_cast %9 : vector<2x8xf32> to vector<2x8x1xf32>
    %11 = vector.broadcast %5 : f32 to vector<2x8x1xf32>
    %12 = arith.addf %10, %11 : vector<2x8x1xf32>
    %c0_7 = arith.constant 0 : index
    %c0_8 = arith.constant 0 : index
    %c0_9 = arith.constant 0 : index
    %13 = vector.load %arg6[%c0_7, %c0_8, %c0_9] : memref<2x1x1xf32, #tpu.memory_space<vmem>>, vector<2x1x1xf32>
    %cst_10 = arith.constant dense<0xFF800000> : vector<2x1xf32>
    %14 = vector.multi_reduction <maximumf>, %12, %cst_10 [1] : vector<2x8x1xf32> to vector<2x1xf32>
    %15 = vector.shape_cast %14 : vector<2x1xf32> to vector<2x1x1xf32>
    %16 = arith.maximumf %13, %15 : vector<2x1x1xf32>
    %17 = arith.subf %13, %16 : vector<2x1x1xf32>
    %18 = math.exp %17 : vector<2x1x1xf32>
    %19 = vector.broadcast %16 : vector<2x1x1xf32> to vector<2x8x1xf32>
    %20 = arith.subf %12, %19 : vector<2x8x1xf32>
    %21 = math.exp %20 : vector<2x8x1xf32>
    %c0_11 = arith.constant 0 : index
    %c0_12 = arith.constant 0 : index
    %c0_13 = arith.constant 0 : index
    %22 = vector.load %arg7[%c0_11, %c0_12, %c0_13] : memref<2x1x1xf32, #tpu.memory_space<vmem>>, vector<2x1x1xf32>
    %23 = arith.mulf %18, %22 : vector<2x1x1xf32>
    %cst_14 = arith.constant dense<0.000000e+00> : vector<2x1xf32>
    %24 = vector.multi_reduction <add>, %21, %cst_14 [1] : vector<2x8x1xf32> to vector<2x1xf32>
    %25 = vector.shape_cast %24 : vector<2x1xf32> to vector<2x1x1xf32>
    %26 = arith.addf %23, %25 : vector<2x1x1xf32>
    %c0_15 = arith.constant 0 : index
    %c0_16 = arith.constant 0 : index
    %c0_17 = arith.constant 0 : index
    %27 = vector.load %arg7[%c0_15, %c0_16, %c0_17] : memref<2x1x1xf32, #tpu.memory_space<vmem>>, vector<2x1x1xf32>
    tpu.vector_store %arg7[%c0_15, %c0_16, %c0_17], %26 {strides = array<i32>} : memref<2x1x1xf32, #tpu.memory_space<vmem>>, vector<2x1x1xf32>,
    %c0_18 = arith.constant 0 : index
    %c0_19 = arith.constant 0 : index
    %c0_20 = arith.constant 0 : index
    %28 = vector.load %arg8[%c0_18, %c0_19, %c0_20] : memref<2x1x32xf32, #tpu.memory_space<vmem>>, vector<2x1x32xf32>
    %29 = vector.broadcast %18 : vector<2x1x1xf32> to vector<2x1x32xf32>
    %30 = arith.mulf %29, %28 : vector<2x1x32xf32>
    %31 = vector.broadcast %21 : vector<2x8x1xf32> to vector<2x8x32xf32>
    %32 = arith.mulf %31, %3 : vector<2x8x32xf32>
    %cst_21 = arith.constant dense<0.000000e+00> : vector<2x32xf32>
    %33 = vector.multi_reduction <add>, %32, %cst_21 [1] : vector<2x8x32xf32> to vector<2x32xf32>
    %34 = vector.shape_cast %33 : vector<2x32xf32> to vector<2x1x32xf32>
    %35 = arith.addf %30, %34 : vector<2x1x32xf32>
    %c0_22 = arith.constant 0 : index
    %c0_23 = arith.constant 0 : index
    %c0_24 = arith.constant 0 : index
    %36 = vector.load %arg8[%c0_22, %c0_23, %c0_24] : memref<2x1x32xf32, #tpu.memory_space<vmem>>, vector<2x1x32xf32>
    tpu.vector_store %arg8[%c0_22, %c0_23, %c0_24], %35 {strides = array<i32>} : memref<2x1x32xf32, #tpu.memory_space<vmem>>, vector<2x1x32xf32>,
    %c0_25 = arith.constant 0 : index
    %c0_26 = arith.constant 0 : index
    %c0_27 = arith.constant 0 : index
    %37 = vector.load %arg6[%c0_25, %c0_26, %c0_27] : memref<2x1x1xf32, #tpu.memory_space<vmem>>, vector<2x1x1xf32>
    tpu.vector_store %arg6[%c0_25, %c0_26, %c0_27], %16 {strides = array<i32>} : memref<2x1x1xf32, #tpu.memory_space<vmem>>, vector<2x1x1xf32>,
    %c1_i32 = arith.constant 1 : i32
    %38 = arith.cmpi eq, %arg1, %c1_i32 : i32
    %39 = arith.extui %38 : i1 to i32
    %c0_i32_28 = arith.constant 0 : i32
    %40 = arith.cmpi ne, %39, %c0_i32_28 : i32
    scf.if %40 {
      %c0_29 = arith.constant 0 : index
      %c0_30 = arith.constant 0 : index
      %c0_31 = arith.constant 0 : index
      %41 = vector.load %arg7[%c0_29, %c0_30, %c0_31] : memref<2x1x1xf32, #tpu.memory_space<vmem>>, vector<2x1x1xf32>
      %42 = tpu.reciprocal %41 : vector<2x1x1xf32> -> vector<2x1x1xf32>
      %c0_32 = arith.constant 0 : index
      %c0_33 = arith.constant 0 : index
      %c0_34 = arith.constant 0 : index
      %43 = vector.load %arg8[%c0_32, %c0_33, %c0_34] : memref<2x1x32xf32, #tpu.memory_space<vmem>>, vector<2x1x32xf32>
      %44 = vector.broadcast %42 : vector<2x1x1xf32> to vector<2x1x32xf32>
      %45 = arith.mulf %43, %44 : vector<2x1x32xf32>
      %46 = vector.shape_cast %45 : vector<2x1x32xf32> to vector<2x32xf32>
      %c0_35 = arith.constant 0 : index
      %c0_36 = arith.constant 0 : index
      %47 = vector.load %arg5[%c0_35, %c0_36] : memref<2x32xf32, #tpu.memory_space<vmem>>, vector<2x32xf32>
      tpu.vector_store %arg5[%c0_35, %c0_36], %46 {strides = array<i32>} : memref<2x32xf32, #tpu.memory_space<vmem>>, vector<2x32xf32>,
    } else {
    }
    return
  }
  func.func @transform_0(%arg0: i32, %arg1: i32) -> (i32, i32, i32) {
    %c0_i32 = arith.constant 0 : i32
    %c0_i32_0 = arith.constant 0 : i32
    return %arg0, %arg1, %c0_i32 : i32, i32, i32
  }
  func.func @transform_1(%arg0: i32, %arg1: i32) -> (i32, i32) {
    %c0_i32 = arith.constant 0 : i32
    %c0_i32_0 = arith.constant 0 : i32
    %c0_i32_1 = arith.constant 0 : i32
    return %c0_i32, %c0_i32_0 : i32, i32
  }
  func.func @transform_2(%arg0: i32, %arg1: i32) -> (i32, i32) {
    %c0_i32 = arith.constant 0 : i32
    %c0_i32_0 = arith.constant 0 : i32
    %c0_i32_1 = arith.constant 0 : i32
    return %c0_i32, %c0_i32_0 : i32, i32
  }
  func.func @transform_3(%arg0: i32, %arg1: i32) -> (i32, i32) {
    %c0_i32 = arith.constant 0 : i32
    %c0_i32_0 = arith.constant 0 : i32
    return %arg0, %c0_i32 : i32, i32
  }
}

</mosaic_0001>

<bundles_post_ra>
// kernel: tpu_custom_call.1
= control target key start
LH: loop header
LB: loop body
LE: loop exit
PB: predicated region body
PF: predicated region fallthrough
CT: control target
= control target key end

     0   :  { %s860_s0 = inlined_call_operand.hbm [shape: f32[2,16,32], index: 0, kind: input, shape index: {}]   ;;  %s861_s1 = inlined_call_operand.vmem [shape: f32[1,32], index: 1, kind: input, shape index: {}]   ;;  %s862_s2 = inlined_call_operand.<no memory space> [shape: f32[1,1], index: 2, kind: input, shape index: {}]   ;;  %s863_s3 = inlined_call_operand.hbm [shape: f32[2,32], index: 3, kind: output, shape index: {}]  }
   0x1   :  { %8 = sst [smem:[#allocation5]] %s862_s2 }
   0x2   :  { %9 = vsyncpa [#allocation7], 0 }
   0x3   :  { %11 = vsyncpa [#allocation7 + $0x1], 0 }
   0x4   :  { %12 = vsyncpa [#allocation8], 0  ;;  %s715_s14 = smov 0   ;;  %s717_s15 = smov 0  }
   0x5   :  { %s719_s16 = smov 0   ;;  %s721_s17 = smov 0  }
   0x6   :  { %s723_s18 = smov 0   ;;  %s725_s19 = smov 0  }
   0x7 LB: > { %s475_s2 = sadd.s32 4294967295, %s680_s19   ;;  %s27_s20 = sadd.s32 1, %s676_s18  ;;  %s680_s19 = sphi %s725_s19, %s18_s19   ;;  %s676_s18 = sphi %s723_s18, %s872_s18   ;;  %s672_s17 = sphi %s721_s17, %s871_s17   ;;  %s668_s16 = sphi %s719_s16, %s870_s16   ;;  %s664_s15 = sphi %s717_s15, %s869_s15   ;;  %s660_s14 = sphi %s715_s14, %s868_s14  }
   0x8   : > { %p28_p0 = scmp.ge.s32.totalorder %s27_s20, 2  ;;  %s39_s21 = sadd.s32 1, %s668_s16 }
   0x9   : > { %p46_p1 = scmp.ne.s32.totalorder %s668_s16, %s664_s15  ;;  %p47_p2 = scmp.eq.s32.totalorder %s680_s19, 0 }
   0xa   : > { %s874_s20 = smov (%p28_p0, %s27_s20), 0  ;;  %p52_p4 = scmp.ne.s32.totalorder %s664_s15, %s660_s14 }
   0xb   : > { %p751_p3 = por %p47_p2, %p46_p1  ;;  %s35_s23 = ssub.s32 %s676_s18, %s874_s20 }
   0xc   : > { %p53_p5 = scmp.eq.s32.totalorder %s475_s2, 0  ;;  %p37_p6 = scmp.eq.s32.totalorder %s35_s23, 0 }
   0xd   : > { %p499_p8 = scmp.lt.s32.totalorder %s680_s19, 2  ;;  %s150_s26 = sand.u32 1, %s668_s16  }
   0xe   : > { %p760_p7 = por %p53_p5, %p52_p4  ;;  %s479_s27 = sshll.u32 %s676_s18, 7 }
   0xf   : > { %s766_s25 = scalar_select %p37_p6, %s668_s16, %s39_s21  }
  0x10   : > { %s478_s28 = sshll.u32 %s150_s26, 4  ;;  %s162_s4 = scalar_lea.hbm %s860_s0, %s479_s27 }
  0x11   : > { %s154_s5 = scalar_lea.vmem [#allocation6], %s478_s28  ;;  %p775_p9 = pnand %p499_p8, %p751_p3 }
  0x12   : > { %s163_s6 = sshll.u32 %s154_s5, 4  ;;  %p480_p10 = scmp.ge.s32.totalorder %s680_s19, 1  ;;  %s164_s6 = int_to_ptr.vmem [resolvable:$true] %s163_s6 }
  0x13   : > { %s151_s8 = scalar_lea.sflag [#allocation7], %s150_s26  ;;  %p576_p11 = pneg %p775_p9 }
  0x14   : > { %s587_s9 = scalar_lea.vmem %s164_s6, 256  ;;  %s682_s10 = smov [#allocation6]  }
  0x15   : > { %p588_p12 = scmp.ne.s32.totalorder %s164_s6, %s587_s9  ;;  %s592_s11 = sshll.u32 %s682_s10, 4  ;;  %s593_s11 = int_to_ptr.vmem [resolvable:$false] %s592_s11 }
  0x16   : > { %s594_s12 = scalar_lea.vmem %s593_s11, 512  ;;  %p595_p1 = scmp.lt.s32.totalorder %s164_s6, %s593_s11 }
  0x17   : > { %p590_p13 = pnand %p588_p12, %p576_p11  ;;  %p596_p2 = scmp.lt.s32.totalorder %s594_s12, %s587_s9 }
  0x19   : > { %p591_p0 = pneg %p590_p13  ;;  %p597_p3 = por %p596_p2, %p595_p1 }
  0x1b   : > { %p598_p4 = pnand %p597_p3, %p591_p0 }
  0x1d   : > { %601 = shalt.err (!%p598_p4)
}
  0x1e   : > { %s683_s13 = smov 256   ;;  %s684_s14 = smov 128  }
  0x1f   : > { %s685_s21 = smov 8   ;;  %p171_p5 = scmp.lt.s32.totalorder %s680_s19, 3 }
  0x20   : > { %498 = dma.hbm_to_vmem [thread:$0]  (!%p775_p9), %s162_s4, 256, %s164_s6, %s151_s8, %s683_s13, %s684_s14, %s685_s21  }
  0x21   : > { %p172_p6 = pnand %p480_p10, %p171_p5 }
  0x22   : > { %s177_s22 = sand.u32 (!%p172_p6), 1, %s664_s15  }
  0x23   : > { %175 = sbr.rel (%p172_p6) target bundleno = 545 (0x221), region = 32  ;;  %s481_s23 = sshll.u32 (!%p172_p6), %s177_s22, 4 }
  0x24   : > { %s178_s26 = scalar_lea.sflag (!%p172_p6), [#allocation7], %s177_s22  ;;  %s181_s27 = scalar_lea.vmem (!%p172_p6), [#allocation6], %s481_s23 }
  0x28   : > { %651 = dma.done.wait (%p760_p7), %s178_s26, 256  }
  0x29   : > { %653 = vsyncadd (%p760_p7), %s178_s26, 4294967040  ;;  %p482_p8 = scmp.ne.s32.totalorder %s672_s17, 0 }
  0x2b   : > { %203 = sbr.rel (%p482_p8) target bundleno = 52 (0x34), region = 40 }
  0x30   : > { %vm204_vm0 = vcmask 0   ;;  %vm209_vm1 = vcmask 253952   ;;  %v686_v0 = vmov -inf   ;;  %v687_v1 = vmov 0.0  }
  0x31   : > { %205 = vst.msk [vmem:[#allocation2] sm:$0x1] %vm204_vm0, %v686_v0  ;;  %206 = vst.msk [vmem:[#allocation2 + $0x1] sm:$0x1] %vm204_vm0, %v686_v0 }
  0x32   : > { %207 = vst.msk [vmem:[#allocation3] sm:$0x1] %vm204_vm0, %v687_v1  ;;  %208 = vst.msk [vmem:[#allocation3 + $0x1] sm:$0x1] %vm204_vm0, %v687_v1 }
  0x33   : > { %210 = vst.msk [vmem:[#allocation4] sm:$0x1] %vm209_vm1, %v687_v1  ;;  %211 = vst.msk [vmem:[#allocation4 + $0x1] sm:$0x1] %vm209_vm1, %v687_v1 }
  0x34 PF: > { %v793_v2 = vld [vmem:[%s181_s27] sm:$0xff]  ;;  %v483_v3 = vld [vmem:[%s861_s1] ss:$0 sm:$0xff]  ;;  %vm224_vm2 = vcmask 261120   ;;  %v688_v9 = vmov 0   ;;  %s215_s24 = sld [smem:[#allocation5]]  ;;  %v258_v15 = vlaneseq }
  0x35   : > { %v798_v4 = vld [vmem:[%s181_s27 + $0x8] sm:$0xff]  ;;  %v222_v5 = vmul.f32 %v483_v3, %v793_v2  ;;  %560 = vset.pattern.permute.xlu0 %v688_v9  ;;  %559 = vset.pattern.permute.xlu1 %v688_v9  ;;  %vm295_vm3 = vcmask 0   ;;  %vm278_vm4 = vcmask 7168   ;;  %vm348_vm5 = vcmask 253952   ;;  %p484_p7 = scmp.ne.s32.totalorder %s672_s17, 1 }
  0x36   : > { %v223_v6 = vmul.f32 %v483_v3, %v798_v4  ;;  %v804_v20 = vshrl.u32 %v258_v15, 7 }
  0x37   : > { %v225_v7 = vsel %vm224_vm2, %v222_v5, 0.0 }
  0x38   : > { %226 = vadd.xlane.f32.xlu0 %v225_v7  ;;  %v228_v8 = vsel %vm224_vm2, %v223_v6, 0.0  ;;  %v234_v25 = vld [vmem:[#allocation2] sm:$0x1]  ;;  %v807_v26 = vsub.s32 0, %v804_v20  ;;  %v235_v31 = vld [vmem:[#allocation2 + $0x1] sm:$0x1] }
  0x39   : > { %v274_v56 = vld [vmem:[#allocation3] sm:$0x1]  ;;  %v275_v62 = vld [vmem:[#allocation3 + $0x1] sm:$0x1] }
  0x3a   : > { %v231_v10 = vstv %s215_s24 }
  0x3c   : > { %229 = vadd.xlane.f32.xlu0 %v228_v8 }
  0xc1   : > { %v227_v11 = vpop.xlane.xlu0 %226 }
  0xc2   : > { %v232_v12 = vadd.f32 %v231_v10, %v227_v11 }
  0xc4   : > { %v236_v13 = vrot.slane %v232_v12, 4 }
  0xc5   : > { %v230_v14 = vpop.xlane.xlu0 %229 }
  0xc6   : > { %v237_v16 = vmax.f32 %v232_v12, %v236_v13  ;;  %v233_v17 = vadd.f32 %v231_v10, %v230_v14 }
  0xc8   : > { %v238_v18 = vrot.slane %v237_v16, 2  ;;  %v242_v19 = vrot.slane %v233_v17, 4 }
  0xca   : > { %v239_v21 = vmax.f32 %v237_v16, %v238_v18  ;;  %v243_v22 = vmax.f32 %v233_v17, %v242_v19 }
  0xcc   : > { %v240_v23 = vrot.slane %v239_v21, 1  ;;  %v244_v24 = vrot.slane %v243_v22, 2 }
  0xce   : > { %v241_v27 = vmax.f32 %v239_v21, %v240_v23  ;;  %v245_v28 = vmax.f32 %v243_v22, %v244_v24  ;;  %v298_v21 = vld [vmem:[#allocation4] sm:$0x1] }
  0xd0   : > { %v248_v29 = vmax.f32 %v234_v25, %v241_v27  ;;  %v246_v30 = vrot.slane %v245_v28, 1 }
  0xd2   : > { %v250_v32 = vsub.f32 %v234_v25, %v248_v29  ;;  %v261_v33 = vrot.slane %v248_v29, %v807_v26  ;;  %351 = vst.msk [vmem:[#allocation2] sm:$0x1] %vm295_vm3, %v248_v29  ;;  %v247_v34 = vmax.f32 %v245_v28, %v246_v30 }
  0xd4   : > { %v252_v35 = vmul.f32 1.442695, %v250_v32  ;;  %v268_v36 = vsub.f32 %v232_v12, %v261_v33  ;;  %v249_v37 = vmax.f32 %v235_v31, %v247_v34 }
  0xd6   : > { %561 = vpow2.f32 %v252_v35  ;;  %v270_v38 = vmul.f32 1.442695, %v268_v36  ;;  %v265_v39 = vrot.slane %v249_v37, %v807_v26  ;;  %352 = vst.msk [vmem:[#allocation2 + $0x1] sm:$0x1] %vm295_vm3, %v249_v37  ;;  %v251_v40 = vsub.f32 %v235_v31, %v249_v37 }
  0xd8   : > { %563 = vpow2.f32 %v270_v38  ;;  %v269_v41 = vsub.f32 %v233_v17, %v265_v39  ;;  %v254_v43 = vmul.f32 1.442695, %v251_v40 }
  0xda   : > { %v272_v42 = vmul.f32 1.442695, %v269_v41 }
  0xdc   : > { %565 = vpow2.f32 %v272_v42 }
  0xdd   : > { %567 = vpow2.f32 %v254_v43 }
  0xe3   : > { %v562_v44 = vpop.eup %561 }
  0xe4   : > { %302 = vperm.xlu0 %560, %v562_v44   ;;  %v276_v59 = vmul.f32 %v562_v44, %v274_v56 }
  0xe5   : > { %v564_v45 = vpop.eup %563 }
  0xe6   : > { %v279_v46 = vsel %vm278_vm4, %v564_v45, 0.0  ;;  %322 = vperm.xlu1 %559, %v564_v45  }
  0xe7   : > { %v280_v47 = vrot.slane %v279_v46, 4 }
  0xe9   : > { %v566_v48 = vpop.eup %565  ;;  %v281_v49 = vadd.f32 %v280_v47, %v279_v46 }
  0xea   : > { %v286_v50 = vsel %vm278_vm4, %v566_v48, 0.0  ;;  %327 = vperm.xlu1 %559, %v566_v48   ;;  %v568_v53 = vpop.eup %567 }
  0xeb   : > { %v282_v51 = vrot.slane %v281_v49, 2  ;;  %v287_v52 = vrot.slane %v286_v50, 4  ;;  %v277_v1 = vmul.f32 %v568_v53, %v275_v62 }
  0xed   : > { %v283_v54 = vadd.f32 %v282_v51, %v281_v49  ;;  %v288_v55 = vadd.f32 %v287_v52, %v286_v50 }
  0xee   : > { %311 = vperm.xlu1 %559, %v568_v53  }
  0xef   : > { %v284_v57 = vrot.slane %v283_v54, 1  ;;  %v289_v58 = vrot.slane %v288_v55, 2 }
  0xf1   : > { %v285_v60 = vadd.f32 %v284_v57, %v283_v54  ;;  %v290_v61 = vadd.f32 %v289_v58, %v288_v55 }
  0xf3   : > { %v293_v63 = vadd.f32 %v285_v60, %v276_v59  ;;  %v291_v0 = vrot.slane %v290_v61, 1 }
  0xf5   : > { %296 = vst.msk [vmem:[#allocation3] sm:$0x1] %vm295_vm3, %v293_v63  ;;  %v292_v3 = vadd.f32 %v291_v0, %v290_v61 }
  0xf7   : > { %v294_v5 = vadd.f32 %v292_v3, %v277_v1 }
  0xf9   : > { %297 = vst.msk [vmem:[#allocation3 + $0x1] sm:$0x1] %vm295_vm3, %v294_v5 }
 0x15f   : > { %v303_v13 = vpop.permute.xlu0 %302 }
 0x160   : > { %v308_v17 = vrot.slane %v303_v13, %v807_v26 }
 0x161   : > { %v323_v6 = vpop.permute.xlu1 %322 }
 0x162   : > { %v330_v7 = vmul.f32 %v323_v6, %v793_v2  ;;  %v318_v24 = vmul.f32 %v308_v17, %v298_v21 }
 0x164   : > { %v332_v8 = vsel %vm224_vm2, %v330_v7, 0.0 }
 0x165   : > { %v333_v9 = vrot.slane %v332_v8, 4  ;;  %v328_v10 = vpop.permute.xlu1 %327 }
 0x166   : > { %v331_v11 = vmul.f32 %v328_v10, %v798_v4  ;;  %v299_v4 = vld [vmem:[#allocation4 + $0x1] sm:$0x1] }
 0x167   : > { %v334_v12 = vadd.f32 %v333_v9, %v332_v8 }
 0x168   : > { %v339_v14 = vsel %vm224_vm2, %v331_v11, 0.0 }
 0x169   : > { %v335_v15 = vrot.slane %v334_v12, 2  ;;  %v340_v16 = vrot.slane %v339_v14, 4  ;;  %v312_v22 = vpop.permute.xlu1 %311 }
 0x16a   : > { %v317_v28 = vrot.slane %v312_v22, %v807_v26 }
 0x16b   : > { %v336_v18 = vadd.f32 %v335_v15, %v334_v12  ;;  %v341_v19 = vadd.f32 %v340_v16, %v339_v14 }
 0x16c   : > { %v319_v32 = vmul.f32 %v317_v28, %v299_v4 }
 0x16d   : > { %v337_v23 = vrot.slane %v336_v18, 1  ;;  %v342_v2 = vrot.slane %v341_v19, 2 }
 0x16f   : > { %v338_v25 = vadd.f32 %v337_v23, %v336_v18  ;;  %v343_v27 = vadd.f32 %v342_v2, %v341_v19 }
 0x171   : > { %v346_v29 = vadd.f32 %v338_v25, %v318_v24  ;;  %v344_v30 = vrot.slane %v343_v27, 1 }
 0x173   : > { %v345_v31 = vadd.f32 %v344_v30, %v343_v27  ;;  %349 = vst.msk [vmem:[#allocation4] sm:$0x1] %vm348_vm5, %v346_v29  ;;  %356 = sbr.rel (%p484_p7) target bundleno = 530 (0x212), region = 44 }
 0x175   : > { %v347_v33 = vadd.f32 %v345_v31, %v319_v32 }
 0x177   : > { %350 = vst.msk [vmem:[#allocation4 + $0x1] sm:$0x1] %vm348_vm5, %v347_v33 }
 0x178   : > { %v357_v34 = vld [vmem:[#allocation3] sm:$0x1]  ;;  %v358_v35 = vld [vmem:[#allocation3 + $0x1] sm:$0x1]  ;;  %v689_v36 = vmov 0   ;;  %vm401_vm6 = vcmask 254976  }
 0x179   : > { %569 = vset.pattern.permute.xlu0 %v689_v36  ;;  %570 = vrcp.f32 %v357_v34  ;;  %v690_v39 = vmov 1966171168  }
 0x17a   : > { %572 = vrcp.f32 %v358_v35  ;;  %v387_v40 = vunpack.c.l.s4 %v690_v39  ;;  %v361_v44 = vld [vmem:[#allocation4] sm:$0x1] }
 0x17c   : > { %v388_v43 = vunpack.c.0.s8 %v387_v40 }
 0x17e   : > { %v362_v45 = vld [vmem:[#allocation4 + $0x1] sm:$0x1]  ;;  %v391_v49 = vsub.s32 %v388_v43, %v804_v20 }
 0x186   : > { %v571_v37 = vpop.eup %570 }
 0x187   : > { %365 = vperm.xlu0 %569, %v571_v37   ;;  %v573_v38 = vpop.eup %572 }
 0x18b   : > { %374 = vperm.xlu0 %569, %v573_v38  }
 0x202   : > { %v366_v41 = vpop.permute.xlu0 %365 }
 0x203   : > { %v371_v42 = vrot.slane %v366_v41, %v807_v26 }
 0x205   : > { %v381_v48 = vmul.f32 %v371_v42, %v361_v44 }
 0x206   : > { %v375_v46 = vpop.permute.xlu0 %374 }
 0x207   : > { %v380_v47 = vrot.slane %v375_v46, %v807_v26 }
 0x209   : > { %v382_v50 = vmul.f32 %v380_v47, %v362_v45 }
 0x20b   : > { %v385_v51 = vcombine.low %v381_v48, %v382_v50 }
 0x20d   : > { %v392_v52 = vrot.slane %v385_v51, %v391_v49 }
 0x20f   : > { %v399_v53 = vrot.slane %v392_v52, %v391_v49 }
 0x211   : > { %402 = vst.msk [vmem:[#allocation9] sm:$0x3] %vm401_vm6, %v399_v53 }
 0x212 PF: > { %p827_p9 = scmp.eq.s32.totalorder %s475_s2, 1  ;;  %s691_s30 = smov [#allocation9]  }
 0x213   : > { %s412_s4 = sshll.u32 %s691_s30, 4  ;;  %s413_s4 = int_to_ptr.vmem [resolvable:$true] %s412_s4 }
 0x214   : > { %s602_s5 = scalar_lea.vmem %s413_s4, 32  ;;  %p609_p13 = scmp.lt.s32.totalorder %s413_s4, %s413_s4 }
 0x215   : > { %p603_p10 = scmp.ne.s32.totalorder %s413_s4, %s602_s5  ;;  %p610_p0 = scmp.lt.s32.totalorder %s602_s5, %s602_s5 }
 0x217   : > { %p604_p11 = pnand %p603_p10, %p827_p9  ;;  %p611_p1 = por %p610_p0, %p609_p13 }
 0x219   : > { %p605_p12 = pneg %p604_p11 }
 0x21b   : > { %p612_p2 = pnand %p611_p1, %p605_p12 }
 0x21d   : > { %615 = shalt.err (!%p612_p2)
}
 0x21e   : > { %492 = dma.vmem_to_hbm [thread:$0]  (%p827_p9), %s413_s4, 32, %s863_s3, [#allocation8]  }
 0x21f   : > { %655 = dma.done.wait (%p827_p9), [#allocation8], 32  }
 0x220   : > { %657 = vsyncadd (%p827_p9), [#allocation8], 4294967264 }
 0x221 PF: > { %s18_s19 = sadd.s32 1, %s680_s19   ;;  %s868_s14 = smov %s664_s15 }
 0x222   : > { %p15_p3 = scmp.ge.s32.totalorder %s18_s19, 4   ;;  %s869_s15 = smov %s668_s16 }
 0x223   : > { %s870_s16 = smov %s766_s25  ;;  %s871_s17 = smov %s676_s18 }
 0x224   : > { %s872_s18 = smov %s874_s20  ;;  %17 = sbr.rel (!%p15_p3) target bundleno = 7 (0x7), region = 78 }
 0x229   :  { %425 = vsyncpa [#allocation7], 1 }
 0x22a   :  { %427 = vsyncpa [#allocation7 + $0x1], 1 }
 0x22b   :  { %428 = vsyncpa [#allocation8], 1 }
 0x22c   :  { %430 = vsyncpa [#allocation8 + $0x1], 1 }

</bundles_post_ra>
